<compile_context>
chip_gen: v7x
topology: tpu7x:2x2x1
jax: 0.10.0
libtpu: 0.0.40
codegen_flags: <defaults>
</compile_context>

<pallas_src>
import math

import jax
import jax.numpy as jnp
from jax.experimental import pallas as pl
from jax.experimental.pallas import tpu as pltpu

EPS = 1e-5
_LANE = 128
_VMEM_LIMIT_BYTES = 32 * 1024 * 1024  # safe on v5e/v6e (128 MiB) and v7x (64 MiB)


def _sublane_multiple(dtype) -> int:
    itemsize = jnp.dtype(dtype).itemsize
    return {1: 32, 2: 16, 4: 8}.get(itemsize, 8)


def _row_tile(rows: int, row_bytes: int, sub: int, block_bytes: int, min_steps: int) -> int:
    """Budget-driven row tile: ~block_bytes of x per block, rounded to the
    sublane multiple, capped so the grid keeps >= min_steps steps (megacore)."""
    if rows <= sub:
        return rows  # single block equal to the full (possibly odd) row extent
    tr = block_bytes // max(row_bytes, 1)
    tr = max(sub, (tr // sub) * sub)
    cap = -(-rows // min_steps)               # ceil(rows / min_steps)
    cap = max(sub, -(-cap // sub) * sub)      # round up to sublane multiple
    tr = min(tr, cap)
    rows_up = -(-rows // sub) * sub
    return max(sub, min(tr, rows_up))


# ----------------------------------------------------------------------------
# Kernels
# ----------------------------------------------------------------------------
def _ln_rowwise_kernel(x_ref, w_ref, b_ref, o_ref):
    # x_ref: (TR, C) with the normalized dim C fully resident on the lane axis.
    x = x_ref[...].astype(jnp.float32)
    inv_c = 1.0 / x.shape[-1]
    mu = jnp.sum(x, axis=-1, keepdims=True) * inv_c            # XLU reduce
    xc = x - mu
    var = jnp.sum(xc * xc, axis=-1, keepdims=True) * inv_c     # biased variance
    inv_std = jax.lax.rsqrt(var + EPS)                         # EUP slot
    y = xc * inv_std * w_ref[...].astype(jnp.float32) + b_ref[...].astype(jnp.float32)
    o_ref[...] = y.astype(o_ref.dtype)


def _ln_packed_kernel(x_ref, w_ref, b_ref, s_ref, st_ref, o_ref):
    # x_ref: (TR, G*C) -- G original rows folded into the lane axis (lane-dense).
    # s_ref: (G*C, G) block-diagonal ones (segment-sum matrix); st_ref: transpose.
    x = x_ref[...].astype(jnp.float32)
    S = s_ref[...]
    ST = st_ref[...]
    c = S.shape[0] // S.shape[1]
    inv_c = 1.0 / c
    # Per-segment mean via tiny MXU matmuls (keeps VALU/XLU slots free).
    mu = jnp.dot(x, S, preferred_element_type=jnp.float32) * inv_c        # (TR, G)
    mu_b = jnp.dot(mu, ST, preferred_element_type=jnp.float32)            # (TR, G*C)
    xc = x - mu_b
    var = jnp.dot(xc * xc, S, preferred_element_type=jnp.float32) * inv_c  # (TR, G)
    inv_std = jax.lax.rsqrt(var + EPS)                                     # EUP slot
    inv_std_b = jnp.dot(inv_std, ST, preferred_element_type=jnp.float32)   # (TR, G*C)
    y = xc * inv_std_b * w_ref[...].astype(jnp.float32) + b_ref[...].astype(jnp.float32)
    o_ref[...] = y.astype(o_ref.dtype)


# ----------------------------------------------------------------------------
# pallas_call wrappers
# ----------------------------------------------------------------------------
def _run_rowwise(x2, weight, bias, rows, C, block_bytes, min_steps):
    sub = _sublane_multiple(x2.dtype)
    itemsize = jnp.dtype(x2.dtype).itemsize
    tr = _row_tile(rows, C * itemsize, sub, block_bytes, min_steps)
    return pl.pallas_call(
        _ln_rowwise_kernel,
        out_shape=jax.ShapeDtypeStruct((rows, C), x2.dtype),
        grid_spec=pltpu.PrefetchScalarGridSpec(
            num_scalar_prefetch=0,
            grid=(pl.cdiv(rows, tr),),
            in_specs=[
                pl.BlockSpec((tr, C), lambda i: (i, 0)),
                pl.BlockSpec((1, C), lambda i: (0, 0)),
                pl.BlockSpec((1, C), lambda i: (0, 0)),
            ],
            out_specs=pl.BlockSpec((tr, C), lambda i: (i, 0)),
        ),
        compiler_params=pltpu.CompilerParams(
            dimension_semantics=("parallel",),
            vmem_limit_bytes=_VMEM_LIMIT_BYTES,
        ),
    )(x2, weight.reshape(1, C), bias.reshape(1, C))


def _run_packed(x2, weight, bias, R, C, g, block_bytes, min_steps):
    GC = g * C
    rows = R // g
    xp = x2.reshape(rows, GC)  # free, layout-preserving reshape
    wp = jnp.tile(weight, g).reshape(1, GC)
    bp = jnp.tile(bias, g).reshape(1, GC)
    seg = jnp.repeat(jnp.arange(g, dtype=jnp.int32), C)                # lane -> segment id
    S = (seg[:, None] == jnp.arange(g, dtype=jnp.int32)[None, :]).astype(jnp.float32)
    ST = jnp.transpose(S)

    sub = _sublane_multiple(x2.dtype)
    itemsize = jnp.dtype(x2.dtype).itemsize
    tr = _row_tile(rows, GC * itemsize, sub, block_bytes, min_steps)

    out = pl.pallas_call(
        _ln_packed_kernel,
        out_shape=jax.ShapeDtypeStruct((rows, GC), x2.dtype),
        grid_spec=pltpu.PrefetchScalarGridSpec(
            num_scalar_prefetch=0,
            grid=(pl.cdiv(rows, tr),),
            in_specs=[
                pl.BlockSpec((tr, GC), lambda i: (i, 0)),
                pl.BlockSpec((1, GC), lambda i: (0, 0)),
                pl.BlockSpec((1, GC), lambda i: (0, 0)),
                pl.BlockSpec((GC, g), lambda i: (0, 0)),   # constant; re-fetch skipped
                pl.BlockSpec((g, GC), lambda i: (0, 0)),
            ],
            out_specs=pl.BlockSpec((tr, GC), lambda i: (i, 0)),
        ),
        compiler_params=pltpu.CompilerParams(
            dimension_semantics=("parallel",),
            vmem_limit_bytes=_VMEM_LIMIT_BYTES,
        ),
    )(xp, wp, bp, S, ST)
    return out.reshape(R, C)


def withbias_layernorm(x, weight, bias, *, block_bytes=1 << 20, min_grid_steps=8):
    """LayerNorm over the last dim with affine weight/bias (biased variance).

    x: (..., C); weight, bias: (C,). Returns same shape/dtype as x.
    """
    orig_shape = x.shape
    C = orig_shape[-1]
    R = math.prod(orig_shape[:-1]) if len(orig_shape) > 1 else 1
    x2 = x.reshape(R, C)

    # Lane packing factor: smallest G with (G*C) % 128 == 0.  Use it when the
    # packing reshape is free (R % G == 0) and C isn't already lane-dense.
    g = _LANE // math.gcd(C, _LANE)
    use_packed = (g > 1) and (g <= 32) and (R % g == 0)

    if use_packed:
        try:
            out = _run_packed(x2, weight, bias, R, C, g, block_bytes, min_grid_steps)
            return out.reshape(orig_shape)
        except Exception:
            # Safety net: fall back to the row-wise kernel if the packed
            # variant fails to lower on some generation.
            pass
    out = _run_rowwise(x2, weight, bias, R, C, block_bytes, min_grid_steps)
    return out.reshape(orig_shape)


def _reference(x, w, b):
    x32 = x.astype(jnp.float32)
    mu = jnp.mean(x32, axis=-1, keepdims=True)
    var = jnp.mean((x32 - mu) ** 2, axis=-1, keepdims=True)
    y = (x32 - mu) / jnp.sqrt(var + EPS) * w + b
    return y.astype(x.dtype)


if __name__ == "__main__":
    key = jax.random.PRNGKey(0)
    kx, kw, kb, kx2, kx3 = jax.random.split(key, 5)

    # Shapes as used in blinddiff: (batch, H*W, C) after to_3d; C = embed_dim = 48.
    B, T, C = 2, 256, 48
    x = jax.random.normal(kx, (B, T, C), dtype=jnp.float32)
    weight = 1.0 + 0.1 * jax.random.normal(kw, (C,), dtype=jnp.float32)
    bias = 0.1 * jax.random.normal(kb, (C,), dtype=jnp.float32)

    out = withbias_layernorm(x, weight, bias)           # packed (lane-dense) path
    jax.block_until_ready(out)
    ref = _reference(x, weight, bias)
    assert out.shape == x.shape, out.shape
    assert jnp.allclose(out, ref, atol=1e-4, rtol=1e-4), float(jnp.max(jnp.abs(out - ref)))

    # Row-wise fallback path + partial boundary block (R not a multiple of 8 or TR).
    x_b = jax.random.normal(kx2, (3, 100, C), dtype=jnp.float32)
    out_b = withbias_layernorm(x_b, weight, bias)
    jax.block_until_ready(out_b)
    ref_b = _reference(x_b, weight, bias)
    assert jnp.allclose(out_b, ref_b, atol=1e-4, rtol=1e-4), float(jnp.max(jnp.abs(out_b - ref_b)))

    # Already lane-dense channel count -> simple XLU-reduce path.
    C2 = 128
    x_c = jax.random.normal(kx3, (2, 64, C2), dtype=jnp.float32)
    w_c = jnp.ones((C2,), jnp.float32)
    b_c = jnp.zeros((C2,), jnp.float32)
    out_c = withbias_layernorm(x_c, w_c, b_c)
    jax.block_until_ready(out_c)
    ref_c = _reference(x_c, w_c, b_c)
    assert jnp.allclose(out_c, ref_c, atol=1e-4, rtol=1e-4), float(jnp.max(jnp.abs(out_c - ref_c)))

    print("KERNEL_OK")
</pallas_src>

<mosaic_0001>
module attributes {stable_mosaic.version = 11 : i64} {
  func.func @_ln_packed_kernel(%arg0: i32, %arg1: memref<8x384xf32, #tpu.memory_space<vmem>>, %arg2: memref<1x384xf32, #tpu.memory_space<vmem>>, %arg3: memref<1x384xf32, #tpu.memory_space<vmem>>, %arg4: memref<384x8xf32, #tpu.memory_space<vmem>>, %arg5: memref<8x384xf32, #tpu.memory_space<vmem>>, %arg6: memref<8x384xf32, #tpu.memory_space<vmem>>) attributes {dimension_semantics = [#tpu.dimension_semantics<parallel>], iteration_bounds = array<i64: 8>, scalar_prefetch = 0 : i64, scratch_operands = 0 : i64, tpu.core_type = #tpu.core_type<tc>, window_params = [{transform_indices = @transform_0, window_bounds = array<i64: 8, 384>}, {pipeline_mode = #tpu.pipeline_mode<synchronous>, transform_indices = @transform_1, window_bounds = array<i64: 1, 384>}, {pipeline_mode = #tpu.pipeline_mode<synchronous>, transform_indices = @transform_2, window_bounds = array<i64: 1, 384>}, {pipeline_mode = #tpu.pipeline_mode<synchronous>, transform_indices = @transform_3, window_bounds = array<i64: 384, 8>}, {pipeline_mode = #tpu.pipeline_mode<synchronous>, transform_indices = @transform_4, window_bounds = array<i64: 8, 384>}, {transform_indices = @transform_5, window_bounds = array<i64: 8, 384>}]} {
    %c0 = arith.constant 0 : index
    %c0_0 = arith.constant 0 : index
    %0 = vector.load %arg1[%c0, %c0_0] : memref<8x384xf32, #tpu.memory_space<vmem>>, vector<8x384xf32>
    %c0_1 = arith.constant 0 : index
    %c0_2 = arith.constant 0 : index
    %1 = vector.load %arg4[%c0_1, %c0_2] : memref<384x8xf32, #tpu.memory_space<vmem>>, vector<384x8xf32>
    %c0_3 = arith.constant 0 : index
    %c0_4 = arith.constant 0 : index
    %2 = vector.load %arg5[%c0_3, %c0_4] : memref<8x384xf32, #tpu.memory_space<vmem>>, vector<8x384xf32>
    %cst = arith.constant dense<0.000000e+00> : vector<8x8xf32>
    %3 = tpu.matmul %0, %1, %cst {dimension_numbers = #tpu.dot_dimension_numbers<[1], [0], [0], [1], [0, 0, 1, 1], [], []>} : vector<8x384xf32>, vector<384x8xf32>, vector<8x8xf32> -> vector<8x8xf32>
    %cst_5 = arith.constant 0.020833334 : f32
    %4 = vector.broadcast %cst_5 : f32 to vector<8x8xf32>
    %5 = arith.mulf %3, %4 : vector<8x8xf32>
    %cst_6 = arith.constant dense<0.000000e+00> : vector<8x384xf32>
    %6 = tpu.matmul %5, %2, %cst_6 {dimension_numbers = #tpu.dot_dimension_numbers<[1], [0], [0], [1], [0, 0, 1, 1], [], []>} : vector<8x8xf32>, vector<8x384xf32>, vector<8x384xf32> -> vector<8x384xf32>
    %7 = arith.subf %0, %6 : vector<8x384xf32>
    %8 = arith.mulf %7, %7 : vector<8x384xf32>
    %cst_7 = arith.constant dense<0.000000e+00> : vector<8x8xf32>
    %9 = tpu.matmul %8, %1, %cst_7 {dimension_numbers = #tpu.dot_dimension_numbers<[1], [0], [0], [1], [0, 0, 1, 1], [], []>} : vector<8x384xf32>, vector<384x8xf32>, vector<8x8xf32> -> vector<8x8xf32>
    %cst_8 = arith.constant 0.020833334 : f32
    %10 = vector.broadcast %cst_8 : f32 to vector<8x8xf32>
    %11 = arith.mulf %9, %10 : vector<8x8xf32>
    %cst_9 = arith.constant 9.99999974E-6 : f32
    %12 = vector.broadcast %cst_9 : f32 to vector<8x8xf32>
    %13 = arith.addf %11, %12 : vector<8x8xf32>
    %14 = math.rsqrt %13 : vector<8x8xf32>
    %cst_10 = arith.constant dense<0.000000e+00> : vector<8x384xf32>
    %15 = tpu.matmul %14, %2, %cst_10 {dimension_numbers = #tpu.dot_dimension_numbers<[1], [0], [0], [1], [0, 0, 1, 1], [], []>} : vector<8x8xf32>, vector<8x384xf32>, vector<8x384xf32> -> vector<8x384xf32>
    %16 = arith.mulf %7, %15 : vector<8x384xf32>
    %c0_11 = arith.constant 0 : index
    %c0_12 = arith.constant 0 : index
    %17 = vector.load %arg2[%c0_11, %c0_12] : memref<1x384xf32, #tpu.memory_space<vmem>>, vector<1x384xf32>
    %18 = vector.broadcast %17 : vector<1x384xf32> to vector<8x384xf32>
    %19 = arith.mulf %16, %18 : vector<8x384xf32>
    %c0_13 = arith.constant 0 : index
    %c0_14 = arith.constant 0 : index
    %20 = vector.load %arg3[%c0_13, %c0_14] : memref<1x384xf32, #tpu.memory_space<vmem>>, vector<1x384xf32>
    %21 = vector.broadcast %20 : vector<1x384xf32> to vector<8x384xf32>
    %22 = arith.addf %19, %21 : vector<8x384xf32>
    %c0_15 = arith.constant 0 : index
    %c0_16 = arith.constant 0 : index
    %23 = vector.load %arg6[%c0_15, %c0_16] : memref<8x384xf32, #tpu.memory_space<vmem>>, vector<8x384xf32>
    tpu.vector_store %arg6[%c0_15, %c0_16], %22 {strides = array<i32>} : memref<8x384xf32, #tpu.memory_space<vmem>>, vector<8x384xf32>,
    return
  }
  func.func @transform_0(%arg0: i32) -> (i32, i32) {
    %c0_i32 = arith.constant 0 : i32
    %c0_i32_0 = arith.constant 0 : i32
    return %arg0, %c0_i32 : i32, i32
  }
  func.func @transform_1(%arg0: i32) -> (i32, i32) {
    %c0_i32 = arith.constant 0 : i32
    %c0_i32_0 = arith.constant 0 : i32
    %c0_i32_1 = arith.constant 0 : i32
    return %c0_i32, %c0_i32_0 : i32, i32
  }
  func.func @transform_2(%arg0: i32) -> (i32, i32) {
    %c0_i32 = arith.constant 0 : i32
    %c0_i32_0 = arith.constant 0 : i32
    %c0_i32_1 = arith.constant 0 : i32
    return %c0_i32, %c0_i32_0 : i32, i32
  }
  func.func @transform_3(%arg0: i32) -> (i32, i32) {
    %c0_i32 = arith.constant 0 : i32
    %c0_i32_0 = arith.constant 0 : i32
    %c0_i32_1 = arith.constant 0 : i32
    return %c0_i32, %c0_i32_0 : i32, i32
  }
  func.func @transform_4(%arg0: i32) -> (i32, i32) {
    %c0_i32 = arith.constant 0 : i32
    %c0_i32_0 = arith.constant 0 : i32
    %c0_i32_1 = arith.constant 0 : i32
    return %c0_i32, %c0_i32_0 : i32, i32
  }
  func.func @transform_5(%arg0: i32) -> (i32, i32) {
    %c0_i32 = arith.constant 0 : i32
    %c0_i32_0 = arith.constant 0 : i32
    return %arg0, %c0_i32 : i32, i32
  }
}

module attributes {stable_mosaic.version = 11 : i64} {
  func.func @_ln_rowwise_kernel(%arg0: i32, %arg1: memref<64x48xf32, #tpu.memory_space<vmem>>, %arg2: memref<1x48xf32, #tpu.memory_space<vmem>>, %arg3: memref<1x48xf32, #tpu.memory_space<vmem>>, %arg4: memref<64x48xf32, #tpu.memory_space<vmem>>) attributes {dimension_semantics = [#tpu.dimension_semantics<parallel>], iteration_bounds = array<i64: 8>, scalar_prefetch = 0 : i64, scratch_operands = 0 : i64, tpu.core_type = #tpu.core_type<tc>, window_params = [{transform_indices = @transform_0, window_bounds = array<i64: 64, 48>}, {pipeline_mode = #tpu.pipeline_mode<synchronous>, transform_indices = @transform_1, window_bounds = array<i64: 1, 48>}, {pipeline_mode = #tpu.pipeline_mode<synchronous>, transform_indices = @transform_2, window_bounds = array<i64: 1, 48>}, {transform_indices = @transform_3, window_bounds = array<i64: 64, 48>}]} {
    %c0 = arith.constant 0 : index
    %c0_0 = arith.constant 0 : index
    %0 = vector.load %arg1[%c0, %c0_0] : memref<64x48xf32, #tpu.memory_space<vmem>>, vector<64x48xf32>
    %cst = arith.constant dense<0.000000e+00> : vector<64xf32>
    %1 = vector.multi_reduction <add>, %0, %cst [1] : vector<64x48xf32> to vector<64xf32>
    %2 = vector.shape_cast %1 : vector<64xf32> to vector<64x1xf32>
    %cst_1 = arith.constant 0.020833334 : f32
    %3 = vector.broadcast %cst_1 : f32 to vector<64x1xf32>
    %4 = arith.mulf %2, %3 : vector<64x1xf32>
    %5 = vector.broadcast %4 : vector<64x1xf32> to vector<64x48xf32>
    %6 = arith.subf %0, %5 : vector<64x48xf32>
    %7 = arith.mulf %6, %6 : vector<64x48xf32>
    %cst_2 = arith.constant dense<0.000000e+00> : vector<64xf32>
    %8 = vector.multi_reduction <add>, %7, %cst_2 [1] : vector<64x48xf32> to vector<64xf32>
    %9 = vector.shape_cast %8 : vector<64xf32> to vector<64x1xf32>
    %cst_3 = arith.constant 0.020833334 : f32
    %10 = vector.broadcast %cst_3 : f32 to vector<64x1xf32>
    %11 = arith.mulf %9, %10 : vector<64x1xf32>
    %cst_4 = arith.constant 9.99999974E-6 : f32
    %12 = vector.broadcast %cst_4 : f32 to vector<64x1xf32>
    %13 = arith.addf %11, %12 : vector<64x1xf32>
    %14 = math.rsqrt %13 : vector<64x1xf32>
    %15 = vector.broadcast %14 : vector<64x1xf32> to vector<64x48xf32>
    %16 = arith.mulf %6, %15 : vector<64x48xf32>
    %c0_5 = arith.constant 0 : index
    %c0_6 = arith.constant 0 : index
    %17 = vector.load %arg2[%c0_5, %c0_6] : memref<1x48xf32, #tpu.memory_space<vmem>>, vector<1x48xf32>
    %18 = vector.broadcast %17 : vector<1x48xf32> to vector<64x48xf32>
    %19 = arith.mulf %16, %18 : vector<64x48xf32>
    %c0_7 = arith.constant 0 : index
    %c0_8 = arith.constant 0 : index
    %20 = vector.load %arg3[%c0_7, %c0_8] : memref<1x48xf32, #tpu.memory_space<vmem>>, vector<1x48xf32>
    %21 = vector.broadcast %20 : vector<1x48xf32> to vector<64x48xf32>
    %22 = arith.addf %19, %21 : vector<64x48xf32>
    %c0_9 = arith.constant 0 : index
    %c0_10 = arith.constant 0 : index
    %23 = vector.load %arg4[%c0_9, %c0_10] : memref<64x48xf32, #tpu.memory_space<vmem>>, vector<64x48xf32>
    tpu.vector_store %arg4[%c0_9, %c0_10], %22 {strides = array<i32>} : memref<64x48xf32, #tpu.memory_space<vmem>>, vector<64x48xf32>,
    return
  }
  func.func @transform_0(%arg0: i32) -> (i32, i32) {
    %c0_i32 = arith.constant 0 : i32
    %c0_i32_0 = arith.constant 0 : i32
    return %arg0, %c0_i32 : i32, i32
  }
  func.func @transform_1(%arg0: i32) -> (i32, i32) {
    %c0_i32 = arith.constant 0 : i32
    %c0_i32_0 = arith.constant 0 : i32
    %c0_i32_1 = arith.constant 0 : i32
    return %c0_i32, %c0_i32_0 : i32, i32
  }
  func.func @transform_2(%arg0: i32) -> (i32, i32) {
    %c0_i32 = arith.constant 0 : i32
    %c0_i32_0 = arith.constant 0 : i32
    %c0_i32_1 = arith.constant 0 : i32
    return %c0_i32, %c0_i32_0 : i32, i32
  }
  func.func @transform_3(%arg0: i32) -> (i32, i32) {
    %c0_i32 = arith.constant 0 : i32
    %c0_i32_0 = arith.constant 0 : i32
    return %arg0, %c0_i32 : i32, i32
  }
}

</mosaic_0001>

<bundles_post_ra>
// kernel: tpu_custom_call.1
= control target key start
LH: loop header
LB: loop body
LE: loop exit
PB: predicated region body
PF: predicated region fallthrough
CT: control target
= control target key end

     0   :  { %10 = vsyncpa [#allocation3], 0  ;;  %s1834_s0 = inlined_call_operand.vmem [shape: f32[64,384], index: 0, kind: input, shape index: {}]   ;;  %s1835_s1 = inlined_call_operand.vmem [shape: f32[1,384], index: 1, kind: input, shape index: {}]   ;;  %s1836_s2 = inlined_call_operand.vmem [shape: f32[1,384], index: 2, kind: input, shape index: {}]   ;;  %s1837_s3 = inlined_call_operand.vmem [shape: f32[384,8], index: 3, kind: input, shape index: {}]   ;;  %s1838_s4 = inlined_call_operand.vmem [shape: f32[8,384], index: 4, kind: input, shape index: {}]   ;;  %s1839_s5 = inlined_call_operand.hbm [shape: f32[64,384], index: 5, kind: output, shape index: {}]  }
   0x1   :  { %12 = vsyncpa [#allocation3 + $0x1], 0  ;;  %s1433_s18 = smov 0   ;;  %s1435_s19 = smov 0  }
   0x2   :  { %s1437_s20 = smov 0   ;;  %s1439_s21 = smov 0  }
   0x3 LB: > { %s1454_s22 = sadd.s32 4294967295, %s1397_s21   ;;  %s976_s23 = sadd.s32 4294967294, %s1397_s21   ;;  %s1397_s21 = sphi %s1439_s21, %s1845_s21   ;;  %s1393_s20 = sphi %s1437_s20, %s1844_s20   ;;  %s1389_s19 = sphi %s1435_s19, %s1843_s19   ;;  %s1385_s18 = sphi %s1433_s18, %s1842_s18  }
   0x4   : > { %s1458_s24 = sadd.s32 1, %s1397_s21   ;;  %s135_s25 = sadd.s32 1, %s1393_s20 }
   0x5   : > { %s132_s26 = ssub.s32 %s1397_s21, %s1458_s24  ;;  %p145_p0 = scmp.ne.s32.totalorder %s1393_s20, %s1389_s19 }
   0x6   : > { %p133_p1 = scmp.eq.s32.totalorder %s132_s26, 0  ;;  %p146_p2 = scmp.eq.s32.totalorder %s1454_s22, 7 }
   0x7   : > { %p151_p3 = scmp.ne.s32.totalorder %s1389_s19, %s1385_s18  ;;  %p152_p4 = scmp.eq.s32.totalorder %s976_s23, 7 }
   0x8   : > { %s1469_s27 = scalar_select %p133_p1, %s1393_s20, %s135_s25  }
   0x9   : > { %p1471_p5 = por %p146_p2, %p145_p0  ;;  %p1475_p6 = por %p152_p4, %p151_p3 }
   0xa   : > { %p979_p7 = scmp.ge.s32.totalorder %s1397_s21, 1  ;;  %p190_p8 = scmp.lt.s32.totalorder %s1397_s21, 9 }
   0xc   : > { %p191_p9 = pnand %p979_p7, %p190_p8 }
   0xd   : > { %v242_v0 = vld [vmem:[%s1837_s3 + $0x80] sm:$0xff] (!%p191_p9)  ;;  %v243_v1 = vld [vmem:[%s1837_s3 + $0x88] sm:$0xff] (!%p191_p9)  ;;  %p218_p10 = scmp.lt.s32.totalorder (!%p191_p9), %s1454_s22, 7  ;;  %v1399_v5 = vmov (!%p191_p9), 0.0|0.0   ;;  %v244_v10 = vld [vmem:[%s1837_s3 + $0x90] sm:$0xff] (!%p191_p9)  ;;  %vm1400_vm0 = vmmov (!%p191_p9), 0  }
   0xe   : > { %194 = sbr.rel (%p191_p9) target bundleno = 950 (0x3b6), region = 40  ;;  %v226_v2 = vld [vmem:[%s1837_s3] sm:$0xff] (!%p191_p9)  ;;  %v1491_v3 = vpack.c.bf16 (!%p191_p9), %v243_v1, %v242_v0  ;;  %v227_v4 = vld [vmem:[%s1837_s3 + $0x8] sm:$0xff] (!%p191_p9)  ;;  %1208 = vmatprep.subr.bf16.mxu1 (!%p191_p9), %v1399_v5  ;;  %v245_v11 = vld [vmem:[%s1837_s3 + $0x98] sm:$0xff] (!%p191_p9)  ;;  %v1401_v13 = vmov (!%p191_p9), 0.0   ;;  %vm418_vm1 = vcmask (!%p191_p9), 64512  }
   0xf   : > { %v258_v6 = vld [vmem:[%s1837_s3 + $0x100] sm:$0xff] (!%p191_p9)  ;;  %v259_v7 = vld [vmem:[%s1837_s3 + $0x108] sm:$0xff] (!%p191_p9)  ;;  %v1503_v8 = vpack.c.bf16 (!%p191_p9), %v227_v4, %v226_v2  ;;  %v228_v12 = vld [vmem:[%s1837_s3 + $0x10] sm:$0xff] (!%p191_p9)  ;;  %1128 = vmatprep.mubr.msk.f32.mxu1 (!%p191_p9), %vm1400_vm0, %v1401_v13  ;;  %v1519_v14 = vpack.c.bf16 (!%p191_p9), %v245_v11, %v244_v10  ;;  %s215_s26 = sand.u32 (!%p191_p9), 1, %s1389_s19   ;;  %s1402_s17 = smov (!%p191_p9), [#allocation2]  }
  0x10   : > { %v1505_v9 = vpack.c.bf16 (!%p191_p9), %v259_v7, %v258_v6  ;;  %1177 = vmatprep.subr.bf16.mxu0 (!%p191_p9), %v1491_v3  ;;  %v229_v15 = vld [vmem:[%s1837_s3 + $0x18] sm:$0xff] (!%p191_p9)  ;;  %v260_v16 = vld [vmem:[%s1837_s3 + $0x110] sm:$0xff] (!%p191_p9)  ;;  %v246_v20 = vld [vmem:[%s1837_s3 + $0xa0] sm:$0xff] (!%p191_p9)  ;;  %s1288_s30 = smul.u32 (!%p191_p9), 24, %s215_s26 }
  0x11   : > { %v261_v17 = vld [vmem:[%s1837_s3 + $0x118] sm:$0xff] (!%p191_p9)  ;;  %1179 = vmatpush3.bf16.msra.mxu0 (!%p191_p9), %v1503_v8  ;;  %v1532_v18 = vpack.c.bf16 (!%p191_p9), %v229_v15, %v228_v12  ;;  %v247_v21 = vld [vmem:[%s1837_s3 + $0xa8] sm:$0xff] (!%p191_p9)  ;;  %v230_v22 = vld [vmem:[%s1837_s3 + $0x20] sm:$0xff] (!%p191_p9) }
  0x12   : > { %1210 = vmatpush3.bf16.msra.mxu1 (!%p191_p9), %v1505_v9  ;;  %v1534_v19 = vpack.c.bf16 (!%p191_p9), %v261_v17, %v260_v16  ;;  %1181 = vmatprep.subr.bf16.mxu0 (!%p191_p9), %v1519_v14  ;;  %v1552_v23 = vpack.c.bf16 (!%p191_p9), %v247_v21, %v246_v20  ;;  %v231_v24 = vld [vmem:[%s1837_s3 + $0x28] sm:$0xff] (!%p191_p9)  ;;  %v262_v25 = vld [vmem:[%s1837_s3 + $0x120] sm:$0xff] (!%p191_p9)  ;;  %v248_v27 = vld [vmem:[%s1837_s3 + $0xb0] sm:$0xff] (!%p191_p9)  ;;  %s217_s9 = scalar_lea.vmem (!%p191_p9), [#allocation2], %s1288_s30 }
  0x13   : > { %1211 = vmatprep.subr.bf16.mxu1 (!%p191_p9), %v1399_v5  ;;  %v263_v26 = vld [vmem:[%s1837_s3 + $0x128] sm:$0xff] (!%p191_p9)  ;;  %v249_v28 = vld [vmem:[%s1837_s3 + $0xb8] sm:$0xff] (!%p191_p9)  ;;  %v1571_v29 = vpack.c.bf16 (!%p191_p9), %v231_v24, %v230_v22  ;;  %v232_v31 = vld [vmem:[%s1837_s3 + $0x30] sm:$0xff] (!%p191_p9)  ;;  %s917_s10 = sshll.u32 (!%p191_p9), %s217_s9, 4  ;;  %s1792_s10 = int_to_ptr.vmem [resolvable:$true] %s917_s10 }
  0x14   : > { %v1573_v30 = vpack.c.bf16 (!%p191_p9), %v263_v26, %v262_v25  ;;  %v1581_v32 = vpack.c.bf16 (!%p191_p9), %v249_v28, %v248_v27  ;;  %v233_v33 = vld [vmem:[%s1837_s3 + $0x38] sm:$0xff] (!%p191_p9)  ;;  %v264_v34 = vld [vmem:[%s1837_s3 + $0x130] sm:$0xff] (!%p191_p9)  ;;  %v250_v36 = vld [vmem:[%s1837_s3 + $0xc0] sm:$0xff] (!%p191_p9)  ;;  %s1335_s14 = scalar_lea.vmem (!%p191_p9), %s1792_s10, 384 }
  0x15   : > { %s1548_s25 = scalar_select %p218_p10, %s1454_s22, 7  ;;  %1183 = vmatpush3.bf16.msra.mxu0 %v1532_v18  ;;  %v265_v35 = vld [vmem:[%s1837_s3 + $0x138] sm:$0xff]  ;;  %v251_v37 = vld [vmem:[%s1837_s3 + $0xc8] sm:$0xff]  ;;  %v1600_v38 = vpack.c.bf16 %v233_v33, %v232_v31  ;;  %v234_v40 = vld [vmem:[%s1837_s3 + $0x40] sm:$0xff] }
  0x16   : > { %1213 = vmatpush3.bf16.msra.mxu1 %v1534_v19  ;;  %1185 = vmatprep.subr.bf16.mxu0 %v1552_v23  ;;  %v1602_v39 = vpack.c.bf16 %v265_v35, %v264_v34  ;;  %v1614_v41 = vpack.c.bf16 %v251_v37, %v250_v36  ;;  %v235_v42 = vld [vmem:[%s1837_s3 + $0x48] sm:$0xff]  ;;  %v266_v43 = vld [vmem:[%s1837_s3 + $0x140] sm:$0xff]  ;;  %v252_v45 = vld [vmem:[%s1837_s3 + $0xd0] sm:$0xff]  ;;  %p1336_p11 = scmp.ne.s32.totalorder %s1792_s10, %s1335_s14 }
  0x17   : > { %s1289_s16 = smul.u32 24, %s1548_s25  ;;  %1214 = vmatprep.subr.bf16.mxu1 %v1399_v5  ;;  %v267_v44 = vld [vmem:[%s1837_s3 + $0x148] sm:$0xff]  ;;  %v253_v46 = vld [vmem:[%s1837_s3 + $0xd8] sm:$0xff]  ;;  %v1636_v48 = vpack.c.bf16 %v235_v42, %v234_v40  ;;  %v236_v50 = vld [vmem:[%s1837_s3 + $0x50] sm:$0xff] }
  0x18   : > { %v1638_v49 = vpack.c.bf16 %v267_v44, %v266_v43  ;;  %v1645_v51 = vpack.c.bf16 %v253_v46, %v252_v45  ;;  %v237_v52 = vld [vmem:[%s1837_s3 + $0x58] sm:$0xff]  ;;  %v268_v53 = vld [vmem:[%s1837_s3 + $0x150] sm:$0xff]  ;;  %v254_v55 = vld [vmem:[%s1837_s3 + $0xe0] sm:$0xff]  ;;  %v861_v43 = vlaneseq  ;;  %s1290_s25 = smul.u32 384, %s1454_s22  ;;  %s903_s22 = scalar_lea.sflag [#allocation3], %s215_s26 }
  0x19   : > { %1187 = vmatpush3.bf16.msra.mxu0 %v1571_v29  ;;  %s1610_s15 = scalar_lea.vmem %s1834_s0, %s1289_s16  ;;  %v269_v54 = vld [vmem:[%s1837_s3 + $0x158] sm:$0xff]  ;;  %v255_v56 = vld [vmem:[%s1837_s3 + $0xe8] sm:$0xff]  ;;  %v1665_v57 = vpack.c.bf16 %v237_v52, %v236_v50  ;;  %v238_v59 = vld [vmem:[%s1837_s3 + $0x60] sm:$0xff]  ;;  %p1337_p12 = pnand %p1336_p11, %p1471_p5 }
  0x1a   : > { %1216 = vmatpush3.bf16.msra.mxu1 %v1573_v30  ;;  %1189 = vmatprep.subr.bf16.mxu0 %v1581_v32  ;;  %v1632_v47 = vld [vmem:[%s1610_s15 + $0x8] sm:$0xff]  ;;  %v1667_v58 = vpack.c.bf16 %v269_v54, %v268_v53  ;;  %v1674_v60 = vpack.c.bf16 %v255_v56, %v254_v55  ;;  %v270_v62 = vld [vmem:[%s1837_s3 + $0x160] sm:$0xff]  ;;  %v256_v0 = vld [vmem:[%s1837_s3 + $0xf0] sm:$0xff]  ;;  %v862_v44 = vshrl.u32 %v861_v43, 7  ;;  %s1790_s13 = scalar_lea.hbm %s1839_s5, %s1290_s25 }
  0x1b   : > { %1217 = vmatprep.subr.bf16.mxu1 %v1399_v5  ;;  %341 = vmatprep.mubr.f32.mxu0 %v1632_v47  ;;  %v239_v61 = vld [vmem:[%s1837_s3 + $0x68] sm:$0xff]  ;;  %v257_v1 = vld [vmem:[%s1837_s3 + $0xf8] sm:$0xff]  ;;  %v240_v6 = vld [vmem:[%s1837_s3 + $0x70] sm:$0xff]  ;;  %p1338_p13 = pneg %p1337_p12 }
  0x1c   : > { %v271_v63 = vld [vmem:[%s1837_s3 + $0x168] sm:$0xff]  ;;  %v1693_v2 = vpack.c.bf16 %v239_v61, %v238_v59  ;;  %v1702_v7 = vpack.c.bf16 %v257_v1, %v256_v0  ;;  %v241_v10 = vld [vmem:[%s1837_s3 + $0x78] sm:$0xff]  ;;  %v272_v11 = vld [vmem:[%s1837_s3 + $0x170] sm:$0xff]  ;;  %v863_v45 = vsub.s32 0, %v862_v44 }
  0x1d   : > { %1191 = vmatpush3.bf16.msra.mxu0 %v1600_v38  ;;  %v1695_v4 = vpack.c.bf16 %v271_v63, %v270_v62  ;;  %v273_v12 = vld [vmem:[%s1837_s3 + $0x178] sm:$0xff]  ;;  %v1206_v15 = vpack.c.bf16 %v241_v10, %v240_v6  ;;  %v223_v17 = vld [vmem:[%s1610_s15] sm:$0xff]  ;;  %v225_v20 = vld [vmem:[%s1610_s15 + $0x10] sm:$0xff]  ;;  %s1339_s15 = sshll.u32 %s1402_s17, 4  ;;  %s1340_s15 = int_to_ptr.vmem [resolvable:$false] %s1339_s15 }
  0x1e   : > { %1219 = vmatpush3.bf16.msra.mxu1 %v1602_v39  ;;  %1193 = vmatprep.subr.bf16.mxu0 %v1614_v41  ;;  %v1230_v16 = vpack.c.bf16 %v273_v12, %v272_v11  ;;  %v275_v21 = vld [vmem:[%s1838_s4 + $0x8] sm:$0xff]  ;;  %v1729_v22 = vld [vmem:[%s1838_s4] sm:$0xff]  ;;  %v276_v24 = vld [vmem:[%s1838_s4 + $0x10] sm:$0xff]  ;;  %s1341_s23 = scalar_lea.vmem %s1340_s15, 768  ;;  %p1342_p0 = scmp.lt.s32.totalorder %s1792_s10, %s1340_s15 }
  0x1f   : > { %1220 = vmatprep.subr.bf16.mxu1 %v1399_v5  ;;  %v859_v46 = vld [vmem:[%s1835_s1] sm:$0x7]  ;;  %p1343_p1 = scmp.lt.s32.totalorder %s1341_s23, %s1335_s14 }
  0x21   : > { %1195 = vmatpush3.bf16.msra.mxu0 %v1636_v48  ;;  %p1344_p2 = por %p1343_p1, %p1342_p0 }
  0x22   : > { %1222 = vmatpush3.bf16.msra.mxu1 %v1638_v49  ;;  %1197 = vmatprep.subr.bf16.mxu0 %v1645_v51 }
  0x23   : > { %1223 = vmatprep.subr.bf16.mxu1 %v1399_v5  ;;  %p1345_p3 = pnand %p1344_p2, %p1338_p13 }
  0x25   : > { %1199 = vmatpush3.bf16.msra.mxu0 %v1665_v57 }
  0x26   : > { %1225 = vmatpush3.bf16.msra.mxu1 %v1667_v58  ;;  %1201 = vmatprep.subr.bf16.mxu0 %v1674_v60 }
  0x27   : > { %1226 = vmatprep.subr.bf16.mxu1 %v1399_v5 }
  0x29   : > { %1203 = vmatpush3.bf16.msra.mxu0 %v1693_v2 }
  0x2a   : > { %1228 = vmatpush3.bf16.msra.mxu1 %v1695_v4  ;;  %1205 = vmatprep.subr.bf16.mxu0 %v1702_v7 }
  0x2b   : > { %1229 = vmatprep.subr.bf16.mxu1 %v1399_v5 }
  0x2d   : > { %1207 = vmatpush3.bf16.msra.mxu0 %v1206_v15 }
  0x2e   : > { %1231 = vmatpush3.bf16.msra.mxu1 %v1230_v16  ;;  %422 = vmatprep.subr.mxu0 %v275_v21 }
  0x2f   : > { %1131 = vmatprep.subr.mxu1 %v1401_v13 }
  0x30   : > { %342 = vmatmul.mubr.f32.vlgmr.msra.gmra.mrb[0].mxu0 %v223_v17 }
  0x31   : > { %1129 = vmatmul.mubr.f32.vlgmr.msra.gmra.mrb[0].mxu1 %v225_v20  ;;  %486 = vmatprep.mubr.f32.mxu0 %v1401_v13 }
  0x32   : > { %1133 = vmatprep.mubr.msk.f32.mxu1 %vm1400_vm0, %v1401_v13  ;;  %423 = vmatpush1.msra.mxu0 %v1729_v22 }
  0x33   : > { %1132 = vmatpush3.msra.mxu1 %v276_v24  ;;  %1233 = vmatprep.subr.bf16.mxu0 %v1491_v3 }
  0x34   : > { %1264 = vmatprep.subr.bf16.mxu1 %v1399_v5 }
 0x103   : > { %v1020_v25 = vpop.f32.mrb[0].mxu0 }
 0x104   : > { %v413_v26 = vpop.f32.mrb[0].mxu1  ;;  %v1021_v27 = vpop.f32.mrb[1].mxu0 }
 0x105   : > { %v1130_v28 = vpop.f32.mrb[1].mxu1  ;;  %v1022_v31 = vadd.f32 %v1021_v27, %v1020_v25 }
 0x107   : > { %v414_v33 = vadd.f32 %v1022_v31, %v413_v26 }
 0x109   : > { %v417_v34 = vmul.f32 0.020833334, %v414_v33 }
 0x10b   : > { %981 = vmatmul.mubr.msk.f32.vlgmr.msra.gmra.mrb[2].mxu0 %vm418_vm1, %v417_v34  ;;  %1134 = vmatmul.mubr.msk.f32.vlgmr.msra.gmra.mrb[2].mxu1 %vm418_vm1, %v417_v34 }
 0x10c   : > { %1266 = vmatpush3.bf16.msra.mxu1 %v1505_v9  ;;  %1235 = vmatpush3.bf16.msra.mxu0 %v1503_v8 }
 0x10d   : > { %1267 = vmatprep.subr.bf16.mxu1 %v1399_v5  ;;  %1237 = vmatprep.subr.bf16.mxu0 %v1519_v14 }
 0x10e   : > { %1168 = vmatprep.mubr.msk.f32.mxu1 %vm1400_vm0, %v1401_v13 }
 0x110   : > { %1269 = vmatpush3.bf16.msra.mxu1 %v1534_v19  ;;  %1239 = vmatpush3.bf16.msra.mxu0 %v1532_v18 }
 0x111   : > { %1270 = vmatprep.subr.bf16.mxu1 %v1399_v5  ;;  %1241 = vmatprep.subr.bf16.mxu0 %v1552_v23 }
 0x114   : > { %1272 = vmatpush3.bf16.msra.mxu1 %v1573_v30  ;;  %1243 = vmatpush3.bf16.msra.mxu0 %v1571_v29 }
 0x115   : > { %1273 = vmatprep.subr.bf16.mxu1 %v1399_v5  ;;  %1245 = vmatprep.subr.bf16.mxu0 %v1581_v32 }
 0x118   : > { %1275 = vmatpush3.bf16.msra.mxu1 %v1602_v39  ;;  %1247 = vmatpush3.bf16.msra.mxu0 %v1600_v38 }
 0x119   : > { %1276 = vmatprep.subr.bf16.mxu1 %v1399_v5  ;;  %1249 = vmatprep.subr.bf16.mxu0 %v1614_v41 }
 0x11c   : > { %1278 = vmatpush3.bf16.msra.mxu1 %v1638_v49  ;;  %1251 = vmatpush3.bf16.msra.mxu0 %v1636_v48  ;;  %v879_v48 = vld [vmem:[%s1836_s2] sm:$0x7]  ;;  %v864_v49 = vrot.slane %v859_v46, %v863_v45 }
 0x11d   : > { %1279 = vmatprep.subr.bf16.mxu1 %v1399_v5  ;;  %1253 = vmatprep.subr.bf16.mxu0 %v1645_v51  ;;  %v884_v55 = vrot.slane %v879_v48, %v863_v45 }
 0x120   : > { %1281 = vmatpush3.bf16.msra.mxu1 %v1667_v58  ;;  %1255 = vmatpush3.bf16.msra.mxu0 %v1665_v57 }
 0x121   : > { %1282 = vmatprep.subr.bf16.mxu1 %v1399_v5  ;;  %1257 = vmatprep.subr.bf16.mxu0 %v1674_v60 }
 0x124   : > { %1284 = vmatpush3.bf16.msra.mxu1 %v1695_v4  ;;  %1259 = vmatpush3.bf16.msra.mxu0 %v1693_v2 }
 0x125   : > { %1285 = vmatprep.subr.bf16.mxu1 %v1399_v5  ;;  %1261 = vmatprep.subr.bf16.mxu0 %v1702_v7 }
 0x128   : > { %1287 = vmatpush3.bf16.msra.mxu1 %v1230_v16  ;;  %1263 = vmatpush3.bf16.msra.mxu0 %v1206_v15 }
 0x129   : > { %715 = vmatprep.subr.mxu0 %v275_v21  ;;  %1171 = vmatprep.subr.mxu1 %v1401_v13 }
 0x1de   : > { %v488_v3 = vpop.f32.mrb[2].mxu0  ;;  %v559_v8 = vpop.f32.mrb[2].mxu1 }
 0x1df   : > { %v563_v9 = vsub.f32 %v223_v17, %v488_v3  ;;  %v565_v14 = vsub.f32 %v225_v20, %v559_v8  ;;  %v490_v18 = vpop.f32.mrb[3].mxu0  ;;  %v1135_v19 = vpop.f32.mrb[3].mxu1 }
 0x1e0   : > { %v564_v23 = vsub.f32 %v1632_v47, %v490_v18  ;;  %v867_v47 = vsub.s32 1, %v862_v44 }
 0x1e1   : > { %v568_v29 = vmul.f32 %v565_v14, %v565_v14  ;;  %v566_v32 = vmul.f32 %v563_v9, %v563_v9 }
 0x1e2   : > { %v567_v30 = vmul.f32 %v564_v23, %v564_v23  ;;  %v868_v53 = vrot.slane %v859_v46, %v867_v47  ;;  %v888_v61 = vrot.slane %v879_v48, %v867_v47 }
 0x1e3   : > { %1169 = vmatmul.mubr.f32.vlgmr.msra.gmra.mrb[4].mxu1 %v568_v29 }
 0x1e4   : > { %633 = vmatprep.mubr.f32.mxu0 %v567_v30  ;;  %1172 = vmatpush3.msra.mxu1 %v276_v24 }
 0x1e5   : > { %634 = vmatmul.mubr.f32.vlgmr.msra.gmra.mrb[4].mxu0 %v566_v32  ;;  %1173 = vmatprep.mubr.msk.f32.mxu1 %vm1400_vm0, %v1401_v13 }
 0x1e6   : > { %716 = vmatpush1.msra.mxu0 %v1729_v22  ;;  %779 = vmatprep.mubr.f32.mxu0 %v1401_v13  ;;  %v871_v13 = vsub.s32 2, %v862_v44 }
 0x1e8   : > { %v872_v50 = vrot.slane %v859_v46, %v871_v13  ;;  %v892_v57 = vrot.slane %v879_v48, %v871_v13 }
 0x2b6   : > { %v705_v5 = vpop.f32.mrb[4].mxu1 }
 0x2b7   : > { %v1170_v35 = vpop.f32.mrb[5].mxu1 }
 0x2b8   : > { %v1074_v36 = vpop.f32.mrb[4].mxu0 }
 0x2b9   : > { %v1075_v37 = vpop.f32.mrb[5].mxu0 }
 0x2ba   : > { %v1076_v38 = vadd.f32 %v1075_v37, %v1074_v36 }
 0x2bc   : > { %v706_v39 = vadd.f32 %v1076_v38, %v705_v5 }
 0x2be   : > { %v709_v40 = vmul.f32 0.020833334, %v706_v39 }
 0x2c0   : > { %v710_v41 = vadd.f32 1e-05, %v709_v40 }
 0x2c2   : > { %1333 = vrsqrt.f32 %v710_v41 }
 0x2cc   : > { %v1334_v42 = vpop.eup %1333 }
 0x2cd   : > { %983 = vmatmul.mubr.msk.f32.vlgmr.msra.gmra.mrb[6].mxu0 %vm418_vm1, %v1334_v42  ;;  %1174 = vmatmul.mubr.msk.f32.vlgmr.msra.gmra.mrb[6].mxu1 %vm418_vm1, %v1334_v42 }
 0x3a0   : > { %v781_v51 = vpop.f32.mrb[6].mxu0  ;;  %v852_v52 = vpop.f32.mrb[6].mxu1 }
 0x3a1   : > { %v856_v54 = vmul.f32 %v781_v51, %v563_v9  ;;  %v858_v56 = vmul.f32 %v852_v52, %v565_v14  ;;  %v783_v58 = vpop.f32.mrb[7].mxu0  ;;  %v1175_v59 = vpop.f32.mrb[7].mxu1 }
 0x3a2   : > { %v857_v60 = vmul.f32 %v783_v58, %v564_v23 }
 0x3a3   : > { %v876_v62 = vmul.f32 %v864_v49, %v856_v54  ;;  %v878_v63 = vmul.f32 %v872_v50, %v858_v56 }
 0x3a4   : > { %v877_v0 = vmul.f32 %v868_v53, %v857_v60 }
 0x3a5   : > { %v896_v1 = vadd.f32 %v884_v55, %v876_v62  ;;  %v898_v2 = vadd.f32 %v892_v57, %v878_v63 }
 0x3a6   : > { %v897_v4 = vadd.f32 %v888_v61, %v877_v0 }
 0x3a7   : > { %899 = vst [vmem:[%s217_s9] sm:$0xff] %v896_v1  ;;  %901 = vst [vmem:[%s217_s9 + $0x10] sm:$0xff] %v898_v2 }
 0x3a8   : > { %900 = vst [vmem:[%s217_s9 + $0x8] sm:$0xff] %v897_v4 }
 0x3a9   : > { %1348 = shalt.err (!%p1345_p3)
}
 0x3aa   : > { %s1349_s26 = scalar_lea.hbm %s1790_s13, 384  ;;  %s1353_s7 = scalar_lea.hbm %s1839_s5, 3072 }
 0x3ab   : > { %p1350_p4 = scmp.ne.s32.totalorder %s1790_s13, %s1349_s26  ;;  %p1354_p9 = scmp.lt.u32.totalorder %s1790_s13, %s1839_s5 }
 0x3ac   : > { %p1355_p10 = scmp.lt.u32.totalorder %s1353_s7, %s1349_s26  ;;  %p1357_p12 = scmp.lt.u32.totalorder %s1349_s26, %s1790_s13 }
 0x3ad   : > { %p1351_p7 = pnand %p1350_p4, %p1471_p5 }
 0x3ae   : > { %p1356_p11 = por %p1355_p10, %p1354_p9 }
 0x3af   : > { %p1352_p8 = pneg %p1351_p7 }
 0x3b0   : > { %p1358_p13 = por %p1357_p12, %p1356_p11 }
 0x3b2   : > { %p1359_p0 = pnand %p1358_p13, %p1352_p8 }
 0x3b4   : > { %1362 = shalt.err (!%p1359_p0)
}
 0x3b5   : > { %1291 = dma.vmem_to_hbm [thread:$0]  (%p1471_p5), %s1792_s10, 384, %s1790_s13, %s903_s22  }
 0x3b6 PF: > { %p1297_p1 = scmp.ge.s32.totalorder %s1397_s21, 2  ;;  %s929_s25 = sand.u32 1, %s1385_s18  }
 0x3b7   : > { %s930_s9 = scalar_lea.sflag [#allocation3], %s929_s25 }
 0x3b8   : > { %p1294_p2 = pnand %p1297_p1, %p1475_p6 }
 0x3ba   : > { %1380 = dma.done.wait (!%p1294_p2), %s930_s9, 384  }
 0x3bb   : > { %1382 = vsyncadd (!%p1294_p2), %s930_s9, 4294966912  ;;  %p15_p3 = scmp.ge.s32.totalorder %s1458_s24, 10   ;;  %s1842_s18 = smov %s1389_s19 }
 0x3bc   : > { %s1843_s19 = smov %s1393_s20  ;;  %s1844_s20 = smov %s1469_s27 }
 0x3bd   : > { %s1845_s21 = smov %s1458_s24  ;;  %17 = sbr.rel (!%p15_p3) target bundleno = 3 (0x3), region = 75 }
 0x3c4   :  { %935 = vsyncpa [#allocation3], 1 }
 0x3c5   :  { %937 = vsyncpa [#allocation3 + $0x1], 1 }

// kernel: tpu_custom_call.1
= control target key start
LH: loop header
LB: loop body
LE: loop exit
PB: predicated region body
PF: predicated region fallthrough
CT: control target
= control target key end

     0   :  { %s446_s12 = smov 0   ;;  %s550_s0 = inlined_call_operand.vmem [shape: f32[512,48], index: 0, kind: input, shape index: {}]   ;;  %s551_s1 = inlined_call_operand.vmem [shape: f32[1,48], index: 1, kind: input, shape index: {}]   ;;  %s552_s2 = inlined_call_operand.vmem [shape: f32[1,48], index: 2, kind: input, shape index: {}]   ;;  %s553_s3 = inlined_call_operand.vmem [shape: f32[512,48], index: 3, kind: output, shape index: {}]  }
   0x1 LB: > { %s381_s13 = sadd.s32 4294967295, %s424_s12   ;;  %p385_p0 = scmp.ge.s32.totalorder %s424_s12, 1  ;;  %s424_s12 = sphi %s446_s12, %s13_s12  }
   0x2   : > { %p138_p1 = scmp.lt.s32.totalorder %s424_s12, 9 }
   0x4   : > { %p139_p2 = pnand %p385_p0, %p138_p1 }
   0x5   : > { %s386_s14 = sshll.u32 (!%p139_p2), %s381_s13, 3  ;;  %vm182_vm0 = vcmask (!%p139_p2), 392192  }
   0x6   : > { %142 = sbr.rel (%p139_p2) target bundleno = 347 (0x15b), region = 32  ;;  %p163_p3 = scmp.lt.s32.totalorder (!%p139_p2), %s386_s14, 63 }
   0xd   : > { %s555_s14 = smov (!%p163_p3, %s386_s14), 63 }
   0xe   : > { %s387_s15 = sshll.u32 %s555_s14, 3 }
   0xf   : > { %s166_s18 = scalar_lea.vmem %s550_s0, %s387_s15  ;;  %s522_s25 = scalar_lea.vmem %s553_s3, %s387_s15 }
  0x10   : > { %v174_v0 = vld [vmem:[%s166_s18] sm:$0xff]  ;;  %v176_v1 = vld [vmem:[%s166_s18 + $0x10] sm:$0xff]  ;;  %v175_v2 = vld [vmem:[%s166_s18 + $0x8] sm:$0xff] }
  0x11   : > { %v183_v3 = vsel %vm182_vm0, %v174_v0, 0.0  ;;  %v189_v4 = vsel %vm182_vm0, %v176_v1, 0.0  ;;  %v177_v5 = vld [vmem:[%s166_s18 + $0x18] sm:$0xff]  ;;  %v186_v6 = vsel %vm182_vm0, %v175_v2, 0.0  ;;  %v178_v8 = vld [vmem:[%s166_s18 + $0x20] sm:$0xff]  ;;  %v179_v9 = vld [vmem:[%s166_s18 + $0x28] sm:$0xff] }
  0x12   : > { %184 = vadd.xlane.f32.xlu0 %v183_v3  ;;  %190 = vadd.xlane.f32.xlu1 %v189_v4  ;;  %v192_v7 = vsel %vm182_vm0, %v177_v5, 0.0  ;;  %v195_v10 = vsel %vm182_vm0, %v178_v8, 0.0  ;;  %v198_v11 = vsel %vm182_vm0, %v179_v9, 0.0  ;;  %v180_v12 = vld [vmem:[%s166_s18 + $0x30] sm:$0xff]  ;;  %v181_v13 = vld [vmem:[%s166_s18 + $0x38] sm:$0xff] }
  0x13   : > { %v201_v14 = vsel %vm182_vm0, %v180_v12, 0.0  ;;  %v204_v15 = vsel %vm182_vm0, %v181_v13, 0.0 }
  0x16   : > { %187 = vadd.xlane.f32.xlu0 %v186_v6  ;;  %193 = vadd.xlane.f32.xlu1 %v192_v7 }
  0x1a   : > { %196 = vadd.xlane.f32.xlu0 %v195_v10  ;;  %199 = vadd.xlane.f32.xlu1 %v198_v11 }
  0x1e   : > { %202 = vadd.xlane.f32.xlu0 %v201_v14  ;;  %205 = vadd.xlane.f32.xlu1 %v204_v15 }
  0x9f   : > { %v185_v16 = vpop.xlane.xlu0 %184  ;;  %v191_v17 = vpop.xlane.xlu1 %190 }
  0xa0   : > { %v207_v18 = vmul.f32 0.020833334, %v185_v16  ;;  %v209_v19 = vmul.f32 0.020833334, %v191_v17  ;;  %v391_v17 = vld [vmem:[%s552_s2] ss:$0 sm:$0xff] }
  0xa2   : > { %v470_v20 = vsub.f32 %v174_v0, %v207_v18  ;;  %v472_v21 = vsub.f32 %v176_v1, %v209_v19 }
  0xa3   : > { %v188_v22 = vpop.xlane.xlu0 %187  ;;  %v194_v23 = vpop.xlane.xlu1 %193 }
  0xa4   : > { %v208_v24 = vmul.f32 0.020833334, %v188_v22  ;;  %v210_v25 = vmul.f32 0.020833334, %v194_v23  ;;  %v223_v26 = vmul.f32 %v470_v20, %v470_v20  ;;  %v225_v27 = vmul.f32 %v472_v21, %v472_v21 }
  0xa6   : > { %v478_v28 = vsub.f32 %v175_v2, %v208_v24  ;;  %v480_v29 = vsub.f32 %v177_v5, %v210_v25  ;;  %v231_v30 = vsel %vm182_vm0, %v223_v26, 0.0  ;;  %v237_v33 = vsel %vm182_vm0, %v225_v27, 0.0 }
  0xa7   : > { %232 = vadd.xlane.f32.xlu0 %v231_v30  ;;  %v197_v31 = vpop.xlane.xlu0 %196  ;;  %v200_v32 = vpop.xlane.xlu1 %199 }
  0xa8   : > { %v211_v34 = vmul.f32 0.020833334, %v197_v31  ;;  %v212_v35 = vmul.f32 0.020833334, %v200_v32  ;;  %v224_v36 = vmul.f32 %v478_v28, %v478_v28  ;;  %v226_v37 = vmul.f32 %v480_v29, %v480_v29 }
  0xaa   : > { %v488_v38 = vsub.f32 %v178_v8, %v211_v34  ;;  %v490_v39 = vsub.f32 %v179_v9, %v212_v35  ;;  %v234_v40 = vsel %vm182_vm0, %v224_v36, 0.0  ;;  %v240_v43 = vsel %vm182_vm0, %v226_v37, 0.0 }
  0xab   : > { %238 = vadd.xlane.f32.xlu0 %v237_v33  ;;  %235 = vadd.xlane.f32.xlu1 %v234_v40  ;;  %v203_v41 = vpop.xlane.xlu0 %202  ;;  %v206_v42 = vpop.xlane.xlu1 %205 }
  0xac   : > { %v213_v44 = vmul.f32 0.020833334, %v203_v41  ;;  %v214_v45 = vmul.f32 0.020833334, %v206_v42  ;;  %v227_v46 = vmul.f32 %v488_v38, %v488_v38  ;;  %v228_v47 = vmul.f32 %v490_v39, %v490_v39 }
  0xae   : > { %v498_v48 = vsub.f32 %v180_v12, %v213_v44  ;;  %v500_v49 = vsub.f32 %v181_v13, %v214_v45  ;;  %v243_v50 = vsel %vm182_vm0, %v227_v46, 0.0  ;;  %v246_v51 = vsel %vm182_vm0, %v228_v47, 0.0  ;;  %v390_v12 = vld [vmem:[%s551_s1] ss:$0 sm:$0xff] }
  0xaf   : > { %241 = vadd.xlane.f32.xlu1 %v240_v43  ;;  %244 = vadd.xlane.f32.xlu0 %v243_v50 }
  0xb0   : > { %v229_v52 = vmul.f32 %v498_v48, %v498_v48  ;;  %v230_v53 = vmul.f32 %v500_v49, %v500_v49 }
  0xb2   : > { %v249_v54 = vsel %vm182_vm0, %v229_v52, 0.0  ;;  %v252_v55 = vsel %vm182_vm0, %v230_v53, 0.0 }
  0xb3   : > { %247 = vadd.xlane.f32.xlu1 %v246_v51  ;;  %250 = vadd.xlane.f32.xlu0 %v249_v54 }
  0xb7   : > { %253 = vadd.xlane.f32.xlu1 %v252_v55 }
 0x134   : > { %v233_v56 = vpop.xlane.xlu0 %232 }
 0x135   : > { %v255_v57 = vmul.f32 0.020833334, %v233_v56 }
 0x137   : > { %v263_v58 = vadd.f32 1e-05, %v255_v57 }
 0x138   : > { %v236_v59 = vpop.xlane.xlu1 %235  ;;  %v239_v60 = vpop.xlane.xlu0 %238 }
 0x139   : > { %402 = vrsqrt.f32 %v263_v58  ;;  %v256_v61 = vmul.f32 0.020833334, %v236_v59  ;;  %v257_v62 = vmul.f32 0.020833334, %v239_v60 }
 0x13b   : > { %v264_v63 = vadd.f32 1e-05, %v256_v61  ;;  %v265_v0 = vadd.f32 1e-05, %v257_v62 }
 0x13c   : > { %v242_v1 = vpop.xlane.xlu1 %241  ;;  %v245_v2 = vpop.xlane.xlu0 %244 }
 0x13d   : > { %404 = vrsqrt.f32 %v264_v63  ;;  %v258_v3 = vmul.f32 0.020833334, %v242_v1  ;;  %v259_v4 = vmul.f32 0.020833334, %v245_v2 }
 0x13e   : > { %406 = vrsqrt.f32 %v265_v0 }
 0x13f   : > { %v266_v5 = vadd.f32 1e-05, %v258_v3  ;;  %v267_v6 = vadd.f32 1e-05, %v259_v4 }
 0x140   : > { %v248_v7 = vpop.xlane.xlu1 %247  ;;  %v251_v8 = vpop.xlane.xlu0 %250 }
 0x141   : > { %408 = vrsqrt.f32 %v266_v5  ;;  %v260_v9 = vmul.f32 0.020833334, %v248_v7  ;;  %v261_v10 = vmul.f32 0.020833334, %v251_v8 }
 0x142   : > { %410 = vrsqrt.f32 %v267_v6 }
 0x143   : > { %v403_v11 = vpop.eup %402  ;;  %v268_v13 = vadd.f32 1e-05, %v260_v9  ;;  %v269_v14 = vadd.f32 1e-05, %v261_v10 }
 0x144   : > { %v279_v15 = vmul.f32 %v403_v11, %v470_v20  ;;  %v254_v16 = vpop.xlane.xlu1 %253 }
 0x145   : > { %412 = vrsqrt.f32 %v268_v13  ;;  %v262_v18 = vmul.f32 0.020833334, %v254_v16 }
 0x146   : > { %v294_v19 = vmul.f32 %v390_v12, %v279_v15  ;;  %414 = vrsqrt.f32 %v269_v14 }
 0x147   : > { %v405_v22 = vpop.eup %404  ;;  %v270_v23 = vadd.f32 1e-05, %v262_v18 }
 0x148   : > { %v407_v20 = vpop.eup %406  ;;  %v309_v24 = vadd.f32 %v391_v17, %v294_v19  ;;  %v280_v25 = vmul.f32 %v405_v22, %v478_v28 }
 0x149   : > { %v281_v26 = vmul.f32 %v407_v20, %v472_v21  ;;  %416 = vrsqrt.f32 %v270_v23 }
 0x14a   : > { %317 = vst.msk [vmem:[%s522_s25] sm:$0xff] %vm182_vm0, %v309_v24  ;;  %v295_v27 = vmul.f32 %v390_v12, %v280_v25 }
 0x14b   : > { %v409_v30 = vpop.eup %408  ;;  %v296_v31 = vmul.f32 %v390_v12, %v281_v26 }
 0x14c   : > { %v411_v32 = vpop.eup %410  ;;  %v310_v33 = vadd.f32 %v391_v17, %v295_v27  ;;  %v282_v34 = vmul.f32 %v409_v30, %v480_v29 }
 0x14d   : > { %v311_v35 = vadd.f32 %v391_v17, %v296_v31  ;;  %v283_v36 = vmul.f32 %v411_v32, %v488_v38 }
 0x14e   : > { %318 = vst.msk [vmem:[%s522_s25 + $0x8] sm:$0xff] %vm182_vm0, %v310_v33  ;;  %v297_v28 = vmul.f32 %v390_v12, %v282_v34 }
 0x14f   : > { %v413_v37 = vpop.eup %412  ;;  %319 = vst.msk [vmem:[%s522_s25 + $0x10] sm:$0xff] %vm182_vm0, %v311_v35  ;;  %v298_v21 = vmul.f32 %v390_v12, %v283_v36 }
 0x150   : > { %v415_v40 = vpop.eup %414  ;;  %v312_v41 = vadd.f32 %v391_v17, %v297_v28  ;;  %v284_v42 = vmul.f32 %v413_v37, %v490_v39 }
 0x151   : > { %v313_v43 = vadd.f32 %v391_v17, %v298_v21  ;;  %v285_v29 = vmul.f32 %v415_v40, %v498_v48 }
 0x152   : > { %320 = vst.msk [vmem:[%s522_s25 + $0x18] sm:$0xff] %vm182_vm0, %v312_v41  ;;  %v299_v38 = vmul.f32 %v390_v12, %v284_v42 }
 0x153   : > { %v417_v44 = vpop.eup %416  ;;  %321 = vst.msk [vmem:[%s522_s25 + $0x20] sm:$0xff] %vm182_vm0, %v313_v43  ;;  %v300_v45 = vmul.f32 %v390_v12, %v285_v29 }
 0x154   : > { %v314_v46 = vadd.f32 %v391_v17, %v299_v38  ;;  %v286_v47 = vmul.f32 %v417_v44, %v500_v49 }
 0x155   : > { %v315_v50 = vadd.f32 %v391_v17, %v300_v45 }
 0x156   : > { %322 = vst.msk [vmem:[%s522_s25 + $0x28] sm:$0xff] %vm182_vm0, %v314_v46  ;;  %v301_v51 = vmul.f32 %v390_v12, %v286_v47 }
 0x157   : > { %323 = vst.msk [vmem:[%s522_s25 + $0x30] sm:$0xff] %vm182_vm0, %v315_v50 }
 0x158   : > { %v316_v39 = vadd.f32 %v391_v17, %v301_v51 }
 0x15a   : > { %324 = vst.msk [vmem:[%s522_s25 + $0x38] sm:$0xff] %vm182_vm0, %v316_v39 }
 0x15b PF: > { %s13_s12 = sadd.s32 1, %s424_s12  }
 0x15c   : > { %p10_p4 = scmp.ge.s32.totalorder %s13_s12, 10  }
 0x15e   :  { %12 = sbr.rel (!%p10_p4) target bundleno = 1 (0x1), region = 62 }

</bundles_post_ra>
